<compile_context>
chip_gen: v6e
topology: v6e:2x2x1
jax: 0.10.0
libtpu: 0.0.40
codegen_flags: <defaults>
</compile_context>

<pallas_src>
import jax
import jax.numpy as jnp
from jax import lax
from jax.experimental import pallas as pl
from jax.experimental.pallas import tpu as pltpu


def moe_kernel(x_ref, wr_ref, br_ref, w1_ref, w2_ref, b2_ref, o_ref):
    B, D = x_ref.shape
    H2 = w1_ref.shape[-1]            # 2 * hidden_dim (both experts fused)
    H = H2 // 2
    Npad = w2_ref.shape[-1]          # 2*D padded up to a multiple of 128

    x = x_ref[...]                                            # (B, D) f32

    # ---- router on the VPU/XLU.  torch.softmax(dim=0) is over the BATCH axis,
    #      which is independent per expert column -> each column separately. ----
    def router_prob(row, bias):
        z = jnp.sum(x * row, axis=-1, keepdims=True) + bias   # (B, 1) f32
        m = jnp.max(z, axis=0, keepdims=True)
        e = jnp.exp(z - m)
        denom = jnp.sum(e, axis=0, keepdims=True)
        return e * pl.reciprocal(denom, approx=True)          # (B, 1) f32

    p0 = router_prob(wr_ref[0:1, :], br_ref[0])               # expert-0 probs
    p1 = router_prob(wr_ref[1:2, :], br_ref[1])               # expert-1 probs

    # ---- fused expert layer 1: one lane-dense (B,D)@(D,2H) bf16 MXU matmul ----
    h = jnp.dot(x.astype(jnp.bfloat16), w1_ref[...],
                preferred_element_type=jnp.float32)           # (B, 2H) f32
    h = jnp.maximum(h, 0.0)

    # ---- hard gate, commuted past the bias-free first matmul.  It must stay
    #      applied before the second matmul + bias so relu(b2) still leaks
    #      through for gated-off rows (as in the PyTorch module). ----
    lane_h = lax.broadcasted_iota(jnp.int32, (B, H2), 1)
    gate_p = jnp.where(lane_h < H, p0, p1)                    # per-lane expert prob
    h = jnp.where(gate_p > 0.5, h, 0.0)

    # ---- fused expert layer 2: (B,2H) @ block_diag(W2a, W2b), padded to Npad --
    out = jnp.dot(h.astype(jnp.bfloat16), w2_ref[...],
                  preferred_element_type=jnp.float32)         # (B, Npad) f32
    out = jnp.maximum(out + b2_ref[...], 0.0)                 # relu(. + [b2a|b2b|0])

    # per-expert scaling by router prob, then sum the two expert output slots
    lane_o = lax.broadcasted_iota(jnp.int32, (B, Npad), 1)
    scale = jnp.where(lane_o < D, p0, p1)                     # pad lanes are 0 anyway
    out = out * scale

    o_ref[...] = (out[:, 0:D] + out[:, D:2 * D]).astype(o_ref.dtype)


def moe_forward(x, packed):
    """x: (B, D) float32.  packed: dict produced by pack_params()."""
    B, D = x.shape
    vmem = pl.BlockSpec(memory_space=pltpu.MemorySpace.VMEM)
    smem = pl.BlockSpec(memory_space=pltpu.MemorySpace.SMEM)
    return pl.pallas_call(
        moe_kernel,
        out_shape=jax.ShapeDtypeStruct((B, D), x.dtype),
        in_specs=[vmem,   # x             (B, D)    f32
                  vmem,   # router weight (2, D)    f32
                  smem,   # router bias   (2,)      f32 scalars
                  vmem,   # fused W1      (D, 2H)   bf16
                  vmem,   # block-diag W2 (2H, Npad) bf16
                  vmem],  # fused b2      (1, Npad) f32
        out_specs=vmem,
    )(x, packed["wr"], packed["br"], packed["w1"], packed["w2"], packed["b2"])


def _round_up(n, m):
    return ((n + m - 1) // m) * m


def init_raw_params(key, dim, hidden_dim, num_experts=2):
    """Synthetic parameters in PyTorch layout (Linear.weight is (out, in))."""
    ks = jax.random.split(key, 8)
    scale = 0.1
    return {
        # O(1)-scale router weights so both gate branches (>0.5 and <=0.5) fire.
        "Wr":  jax.random.normal(ks[0], (num_experts, dim), jnp.float32),
        "br":  scale * jax.random.normal(ks[1], (num_experts,), jnp.float32),
        "W1a": scale * jax.random.normal(ks[2], (hidden_dim, dim), jnp.float32),
        "W2a": scale * jax.random.normal(ks[3], (dim, hidden_dim), jnp.float32),
        "b2a": scale * jax.random.normal(ks[4], (dim,), jnp.float32),
        "W1b": scale * jax.random.normal(ks[5], (hidden_dim, dim), jnp.float32),
        "W2b": scale * jax.random.normal(ks[6], (dim, hidden_dim), jnp.float32),
        "b2b": scale * jax.random.normal(ks[7], (dim,), jnp.float32),
    }


def pack_params(raw):
    """Fuse / transpose / pad the raw PyTorch-layout params for the kernel."""
    hidden, dim = raw["W1a"].shape
    n_pad = _round_up(max(2 * dim, 128), 128)   # lane-dense second-layer output

    # Fused first layer: [W1a.T | W1b.T] -> (dim, 2*hidden), bf16 MXU operand.
    w1 = jnp.concatenate([raw["W1a"].T, raw["W1b"].T], axis=1).astype(jnp.bfloat16)

    # Fused second layer: block_diag(W2a.T, W2b.T), zero-padded to n_pad columns.
    w2 = jnp.zeros((2 * hidden, n_pad), jnp.float32)
    w2 = w2.at[:hidden, :dim].set(raw["W2a"].T)
    w2 = w2.at[hidden:, dim:2 * dim].set(raw["W2b"].T)
    w2 = w2.astype(jnp.bfloat16)

    # Fused second-layer bias row: [b2a | b2b | 0...], kept in f32.
    b2 = jnp.zeros((1, n_pad), jnp.float32)
    b2 = b2.at[0, :dim].set(raw["b2a"])
    b2 = b2.at[0, dim:2 * dim].set(raw["b2b"])

    return {
        "wr": raw["Wr"],            # (2, dim) f32, rows used directly on the VPU
        "br": raw["br"],            # (2,) f32 scalars in SMEM
        "w1": w1,                   # (dim, 2*hidden) bf16
        "w2": w2,                   # (2*hidden, n_pad) bf16
        "b2": b2,                   # (1, n_pad) f32
    }


def moe_reference(x, p):
    """Pure-JAX f32 reference mirroring the PyTorch forward exactly."""
    logits = x @ p["Wr"].T + p["br"]
    probs = jax.nn.softmax(logits, axis=0)          # softmax over batch (dim=0)
    p0 = probs[:, 0:1]
    p1 = probs[:, 1:2]

    def expert(xk, W1, W2, b2):
        h = jnp.maximum(xk @ W1.T, 0.0)
        return jnp.maximum(h @ W2.T + b2, 0.0)

    y0 = expert(jnp.where(p0 > 0.5, x, 0.0), p["W1a"], p["W2a"], p["b2a"]) * p0
    y1 = expert(jnp.where(p1 > 0.5, x, 0.0), p["W1b"], p["W2b"], p["b2b"]) * p1
    return y0 + y1


if __name__ == "__main__":
    B, D, H = 16, 32, 64          # batch=16, dim=32, hidden=64 (2H = 128 lanes)
    key = jax.random.PRNGKey(0)
    kx, kp = jax.random.split(key)
    x = jax.random.normal(kx, (B, D), jnp.float32)

    raw = init_raw_params(kp, D, H)
    packed = pack_params(raw)

    y = jax.block_until_ready(moe_forward(x, packed))
    y_ref = moe_reference(x, raw)

    assert y.shape == (B, D)
    # bf16 MXU operands -> relaxed tolerance vs the pure-f32 reference.
    assert jnp.allclose(y, y_ref, atol=3e-2, rtol=3e-2), (
        f"mismatch vs reference (max abs err {float(jnp.max(jnp.abs(y - y_ref)))})")

    print("KERNEL_OK")
</pallas_src>

<mosaic_0001>
module attributes {stable_mosaic.version = 11 : i64} {
  func.func @moe_kernel(%arg0: memref<16x32xf32, #tpu.memory_space<vmem>>, %arg1: memref<2x32xf32, #tpu.memory_space<vmem>>, %arg2: memref<2xf32, #tpu.memory_space<smem>>, %arg3: memref<32x128xbf16, #tpu.memory_space<vmem>>, %arg4: memref<128x128xbf16, #tpu.memory_space<vmem>>, %arg5: memref<1x128xf32, #tpu.memory_space<vmem>>, %arg6: memref<16x32xf32, #tpu.memory_space<vmem>>) attributes {dimension_semantics = [], scalar_prefetch = 0 : i64, scratch_operands = 0 : i64, tpu.core_type = #tpu.core_type<tc>} {
    %c0 = arith.constant 0 : index
    %c0_0 = arith.constant 0 : index
    %0 = vector.load %arg0[%c0, %c0_0] : memref<16x32xf32, #tpu.memory_space<vmem>>, vector<16x32xf32>
    %c0_1 = arith.constant 0 : index
    %c0_2 = arith.constant 0 : index
    %1 = vector.load %arg1[%c0_1, %c0_2] : memref<2x32xf32, #tpu.memory_space<vmem>>, vector<1x32xf32>
    %c0_3 = arith.constant 0 : index
    %2 = memref.load %arg2[%c0_3] : memref<2xf32, #tpu.memory_space<smem>>
    %3 = vector.broadcast %1 : vector<1x32xf32> to vector<16x32xf32>
    %4 = arith.mulf %0, %3 : vector<16x32xf32>
    %cst = arith.constant dense<0.000000e+00> : vector<16xf32>
    %5 = vector.multi_reduction <add>, %4, %cst [1] : vector<16x32xf32> to vector<16xf32>
    %6 = vector.shape_cast %5 : vector<16xf32> to vector<16x1xf32>
    %7 = vector.broadcast %2 : f32 to vector<16x1xf32>
    %8 = arith.addf %6, %7 : vector<16x1xf32>
    %cst_4 = arith.constant dense<0xFF800000> : vector<1xf32>
    %9 = vector.multi_reduction <maximumf>, %8, %cst_4 [0] : vector<16x1xf32> to vector<1xf32>
    %10 = vector.shape_cast %9 : vector<1xf32> to vector<1x1xf32>
    %11 = vector.broadcast %10 : vector<1x1xf32> to vector<16x1xf32>
    %12 = arith.subf %8, %11 : vector<16x1xf32>
    %13 = math.exp %12 : vector<16x1xf32>
    %cst_5 = arith.constant dense<0.000000e+00> : vector<1xf32>
    %14 = vector.multi_reduction <add>, %13, %cst_5 [0] : vector<16x1xf32> to vector<1xf32>
    %15 = vector.shape_cast %14 : vector<1xf32> to vector<1x1xf32>
    %16 = tpu.reciprocal %15 {approx = true} : vector<1x1xf32> -> vector<1x1xf32>
    %17 = vector.broadcast %16 : vector<1x1xf32> to vector<16x1xf32>
    %18 = arith.mulf %13, %17 : vector<16x1xf32>
    %c1 = arith.constant 1 : index
    %c0_6 = arith.constant 0 : index
    %19 = vector.load %arg1[%c1, %c0_6] : memref<2x32xf32, #tpu.memory_space<vmem>>, vector<1x32xf32>
    %c1_7 = arith.constant 1 : index
    %20 = memref.load %arg2[%c1_7] : memref<2xf32, #tpu.memory_space<smem>>
    %21 = vector.broadcast %19 : vector<1x32xf32> to vector<16x32xf32>
    %22 = arith.mulf %0, %21 : vector<16x32xf32>
    %cst_8 = arith.constant dense<0.000000e+00> : vector<16xf32>
    %23 = vector.multi_reduction <add>, %22, %cst_8 [1] : vector<16x32xf32> to vector<16xf32>
    %24 = vector.shape_cast %23 : vector<16xf32> to vector<16x1xf32>
    %25 = vector.broadcast %20 : f32 to vector<16x1xf32>
    %26 = arith.addf %24, %25 : vector<16x1xf32>
    %cst_9 = arith.constant dense<0xFF800000> : vector<1xf32>
    %27 = vector.multi_reduction <maximumf>, %26, %cst_9 [0] : vector<16x1xf32> to vector<1xf32>
    %28 = vector.shape_cast %27 : vector<1xf32> to vector<1x1xf32>
    %29 = vector.broadcast %28 : vector<1x1xf32> to vector<16x1xf32>
    %30 = arith.subf %26, %29 : vector<16x1xf32>
    %31 = math.exp %30 : vector<16x1xf32>
    %cst_10 = arith.constant dense<0.000000e+00> : vector<1xf32>
    %32 = vector.multi_reduction <add>, %31, %cst_10 [0] : vector<16x1xf32> to vector<1xf32>
    %33 = vector.shape_cast %32 : vector<1xf32> to vector<1x1xf32>
    %34 = tpu.reciprocal %33 {approx = true} : vector<1x1xf32> -> vector<1x1xf32>
    %35 = vector.broadcast %34 : vector<1x1xf32> to vector<16x1xf32>
    %36 = arith.mulf %31, %35 : vector<16x1xf32>
    %37 = arith.truncf %0 : vector<16x32xf32> to vector<16x32xbf16>
    %c0_11 = arith.constant 0 : index
    %c0_12 = arith.constant 0 : index
    %38 = vector.load %arg3[%c0_11, %c0_12] : memref<32x128xbf16, #tpu.memory_space<vmem>>, vector<32x128xbf16>
    %cst_13 = arith.constant dense<0.000000e+00> : vector<16x128xf32>
    %39 = tpu.matmul %37, %38, %cst_13 {dimension_numbers = #tpu.dot_dimension_numbers<[1], [0], [0], [1], [0, 0, 1, 1], [], []>} : vector<16x32xbf16>, vector<32x128xbf16>, vector<16x128xf32> -> vector<16x128xf32>
    %cst_14 = arith.constant 0.000000e+00 : f32
    %40 = vector.broadcast %cst_14 : f32 to vector<16x128xf32>
    %41 = arith.maximumf %39, %40 : vector<16x128xf32>
    %42 = tpu.iota {dimensions = array<i32: 1>} : vector<16x128xi32>
    %c64_i32 = arith.constant 64 : i32
    %43 = vector.broadcast %c64_i32 : i32 to vector<16x128xi32>
    %44 = arith.cmpi slt, %42, %43 : vector<16x128xi32>
    %45 = vector.shape_cast %18 : vector<16x1xf32> to vector<16x1xf32>
    %46 = vector.broadcast %45 : vector<16x1xf32> to vector<16x128xf32>
    %47 = vector.shape_cast %36 : vector<16x1xf32> to vector<16x1xf32>
    %48 = vector.broadcast %47 : vector<16x1xf32> to vector<16x128xf32>
    %49 = arith.select %44, %46, %48 : vector<16x128xi1>, vector<16x128xf32>
    %cst_15 = arith.constant 5.000000e-01 : f32
    %50 = vector.broadcast %cst_15 : f32 to vector<16x128xf32>
    %51 = arith.cmpf ogt, %49, %50 : vector<16x128xf32>
    %cst_16 = arith.constant 0.000000e+00 : f32
    %52 = vector.broadcast %cst_16 : f32 to vector<16x128xf32>
    %53 = arith.select %51, %41, %52 : vector<16x128xi1>, vector<16x128xf32>
    %54 = arith.truncf %53 : vector<16x128xf32> to vector<16x128xbf16>
    %c0_17 = arith.constant 0 : index
    %c0_18 = arith.constant 0 : index
    %55 = vector.load %arg4[%c0_17, %c0_18] : memref<128x128xbf16, #tpu.memory_space<vmem>>, vector<128x128xbf16>
    %cst_19 = arith.constant dense<0.000000e+00> : vector<16x128xf32>
    %56 = tpu.matmul %54, %55, %cst_19 {dimension_numbers = #tpu.dot_dimension_numbers<[1], [0], [0], [1], [0, 0, 1, 1], [], []>} : vector<16x128xbf16>, vector<128x128xbf16>, vector<16x128xf32> -> vector<16x128xf32>
    %c0_20 = arith.constant 0 : index
    %c0_21 = arith.constant 0 : index
    %57 = vector.load %arg5[%c0_20, %c0_21] : memref<1x128xf32, #tpu.memory_space<vmem>>, vector<1x128xf32>
    %58 = vector.broadcast %57 : vector<1x128xf32> to vector<16x128xf32>
    %59 = arith.addf %56, %58 : vector<16x128xf32>
    %cst_22 = arith.constant 0.000000e+00 : f32
    %60 = vector.broadcast %cst_22 : f32 to vector<16x128xf32>
    %61 = arith.maximumf %59, %60 : vector<16x128xf32>
    %62 = tpu.iota {dimensions = array<i32: 1>} : vector<16x128xi32>
    %c32_i32 = arith.constant 32 : i32
    %63 = vector.broadcast %c32_i32 : i32 to vector<16x128xi32>
    %64 = arith.cmpi slt, %62, %63 : vector<16x128xi32>
    %65 = vector.shape_cast %18 : vector<16x1xf32> to vector<16x1xf32>
    %66 = vector.broadcast %65 : vector<16x1xf32> to vector<16x128xf32>
    %67 = vector.shape_cast %36 : vector<16x1xf32> to vector<16x1xf32>
    %68 = vector.broadcast %67 : vector<16x1xf32> to vector<16x128xf32>
    %69 = arith.select %64, %66, %68 : vector<16x128xi1>, vector<16x128xf32>
    %70 = arith.mulf %61, %69 : vector<16x128xf32>
    %71 = vector.extract_strided_slice %70 {offsets = [0, 0], sizes = [16, 32], strides = [1, 1]} : vector<16x128xf32> to vector<16x32xf32>
    %72 = vector.extract_strided_slice %70 {offsets = [0, 32], sizes = [16, 32], strides = [1, 1]} : vector<16x128xf32> to vector<16x32xf32>
    %73 = arith.addf %71, %72 : vector<16x32xf32>
    %c0_23 = arith.constant 0 : index
    %c0_24 = arith.constant 0 : index
    %74 = vector.load %arg6[%c0_23, %c0_24] : memref<16x32xf32, #tpu.memory_space<vmem>>, vector<16x32xf32>
    tpu.vector_store %arg6[%c0_23, %c0_24], %73 {strides = array<i32>} : memref<16x32xf32, #tpu.memory_space<vmem>>, vector<16x32xf32>,
    return
  }
}

</mosaic_0001>

<bundles_post_ra>
// kernel: tpu_custom_call.1
= control target key start
LH: loop header
LB: loop body
LE: loop exit
PB: predicated region body
PF: predicated region fallthrough
CT: control target
= control target key end

     0   :  { %11 = vsyncpa [#allocation3], 0  ;;  %s697_s0 = inlined_call_operand.hbm [shape: f32[16,32], index: 0, kind: input, shape index: {}]   ;;  %s698_s1 = inlined_call_operand.hbm [shape: f32[2,32], index: 1, kind: input, shape index: {}]   ;;  %s699_s2 = inlined_call_operand.vmem [shape: f32[2], index: 2, kind: input, shape index: {}]   ;;  %s700_s3 = inlined_call_operand.hbm [shape: bf16[32,128], index: 3, kind: input, shape index: {}]   ;;  %s701_s4 = inlined_call_operand.hbm [shape: bf16[128,128], index: 4, kind: input, shape index: {}]   ;;  %s702_s5 = inlined_call_operand.vmem [shape: f32[1,128], index: 5, kind: input, shape index: {}]   ;;  %s703_s6 = inlined_call_operand.hbm [shape: f32[16,32], index: 6, kind: output, shape index: {}]  }
   0x1   :  { %12 = vsyncpa [#allocation7], 0 }
   0x2   :  { %13 = vsyncpa [#allocation5], 0 }
   0x3   :  { %14 = vsyncpa [#allocation11], 0 }
   0x4   :  { %15 = vsyncpa [#allocation4], 0  ;;  %s615_s21 = smov [#allocation6]   ;;  %s616_s23 = smov [#allocation2]  }
   0x5   :  { %s34_s22 = sshll.u32 %s615_s21, 4  ;;  %s21_s24 = sshll.u32 %s616_s23, 4  ;;  %s35_s22 = int_to_ptr.vmem [resolvable:$true] %s34_s22  ;;  %s22_s24 = int_to_ptr.vmem [resolvable:$true] %s21_s24 }
   0x6   :  { %s499_s25 = scalar_lea.vmem %s35_s22, 32  ;;  %p504_p1 = scmp.lt.s32.totalorder %s35_s22, %s35_s22 }
   0x7   :  { %p500_p0 = scmp.ne.s32.totalorder %s35_s22, %s499_s25  ;;  %p505_p2 = scmp.lt.s32.totalorder %s499_s25, %s499_s25 }
   0x9   :  { %p506_p3 = por %p505_p2, %p504_p1 }
   0xb   :  { %p507_p4 = pnand %p506_p3, %p500_p0 }
   0xd   :  { %510 = shalt.err (!%p507_p4)
}
   0xe   :  { %37 = dma.hbm_to_vmem [thread:$0]  %s698_s1, 32, %s35_s22, [#allocation7]  }
   0xf   :  { %s519_s28 = scalar_lea.vmem %s22_s24, 256  ;;  %p524_p6 = scmp.lt.s32.totalorder %s22_s24, %s22_s24 }
  0x10   :  { %p520_p5 = scmp.ne.s32.totalorder %s22_s24, %s519_s28  ;;  %p525_p7 = scmp.lt.s32.totalorder %s519_s28, %s519_s28 }
  0x12   :  { %p526_p8 = por %p525_p7, %p524_p6 }
  0x14   :  { %p527_p9 = pnand %p526_p8, %p520_p5 }
  0x16   :  { %530 = shalt.err (!%p527_p9)
}
  0x17   :  { %s617_s29 = smov 128   ;;  %s618_s30 = smov 8  }
  0x18   :  { %27 = dma.hbm_to_vmem [thread:$0]  %s697_s0, 256, %s22_s24, [#allocation3], %s617_s29, %s617_s29, %s618_s30  }
  0x19   :  { %s44_s1 = sshll.u32 %s699_s2, 4  ;;  %s45_s1 = int_to_ptr.vmem [resolvable:$true] %s44_s1 }
  0x1a   :  { %s531_s11 = scalar_lea.vmem %s45_s1, 16  ;;  %p536_p11 = scmp.lt.s32.totalorder %s45_s1, %s45_s1 }
  0x1b   :  { %p532_p10 = scmp.ne.s32.totalorder %s45_s1, %s531_s11  ;;  %p537_p12 = scmp.lt.s32.totalorder %s531_s11, %s531_s11 }
  0x1d   :  { %p538_p13 = por %p537_p12, %p536_p11 }
  0x1f   :  { %p539_p0 = pnand %p538_p13, %p532_p10 }
  0x21   :  { %542 = shalt.err (!%p539_p0)
}
  0x22   :  { %s619_s12 = smov [#allocation8]   ;;  %s620_s13 = smov [#allocation9]  }
  0x23   :  { %47 = dma.vmem_to_smem %s45_s1, 16, %s619_s12, [#allocation5]  }
  0x24   :  { %s53_s14 = sshll.u32 %s620_s13, 4  ;;  %s54_s14 = int_to_ptr.vmem [resolvable:$true] %s53_s14 }
  0x25   :  { %s551_s15 = scalar_lea.vmem %s54_s14, 256  ;;  %p556_p2 = scmp.lt.s32.totalorder %s54_s14, %s54_s14 }
  0x26   :  { %p552_p1 = scmp.ne.s32.totalorder %s54_s14, %s551_s15  ;;  %p557_p3 = scmp.lt.s32.totalorder %s551_s15, %s551_s15 }
  0x28   :  { %p558_p4 = por %p557_p3, %p556_p2 }
  0x2a   :  { %p559_p5 = pnand %p558_p4, %p552_p1 }
  0x2c   :  { %562 = shalt.err (!%p559_p5)
}
  0x2d   :  { %s621_s0 = smov 64   ;;  %s622_s2 = smov 4  }
  0x2e   :  { %59 = dma.hbm_to_vmem [thread:$0]  %s700_s3, 256, %s54_s14, [#allocation7], %s621_s0, %s621_s0, %s622_s2  }
  0x2f   :  { %s623_s18 = smov [#allocation10]  }
  0x30   :  { %s65_s19 = sshll.u32 %s623_s18, 4  ;;  %s66_s19 = int_to_ptr.vmem [resolvable:$true] %s65_s19 }
  0x31   :  { %s571_s20 = scalar_lea.vmem %s66_s19, 1024  ;;  %p576_p7 = scmp.lt.s32.totalorder %s66_s19, %s66_s19 }
  0x32   :  { %p572_p6 = scmp.ne.s32.totalorder %s66_s19, %s571_s20  ;;  %p577_p8 = scmp.lt.s32.totalorder %s571_s20, %s571_s20 }
  0x34   :  { %p578_p9 = por %p577_p8, %p576_p7 }
  0x36   :  { %p579_p10 = pnand %p578_p9, %p572_p6 }
  0x38   :  { %582 = shalt.err (!%p579_p10)
}
  0x39   :  { %71 = dma.hbm_to_vmem [thread:$0]  %s701_s4, 1024, %s66_s19, [#allocation11], %s621_s0, %s621_s0, %s622_s2  }
  0x3a   :  { %603 = dma.done.wait [#allocation3], 256  }
  0x3b   :  { %604 = vsyncadd [#allocation3], 4294967040 }
  0x3c   :  { %605 = dma.done.wait [#allocation7], 32  }
  0x3d   :  { %606 = vsyncadd [#allocation7], 4294967264 }
  0x3e   :  { %607 = dma.done.wait [#allocation5], 16  }
  0x3f   :  { %608 = vsyncadd [#allocation5], 4294967280 }
  0x40   :  { %609 = dma.done.wait [#allocation7], 256  }
  0x41   :  { %610 = vsyncadd [#allocation7], 4294967040 }
  0x42   :  { %611 = dma.done.wait [#allocation11], 1024  }
  0x43   :  { %612 = vsyncadd [#allocation11], 4294966272 }
  0x44   :  { %89 = sfence }
  0x45   :  { %v469_v0 = vld [vmem:[#allocation9 + $0x8] sm:$0xff]   ;;  %v624_v1 = vmov 0.0   ;;  %vm101_vm0 = vcmask 261120   ;;  %v400_v3 = vld [vmem:[#allocation6 + $0x1] ss:$0 sm:$0xff]  ;;  %v470_v7 = vld [vmem:[#allocation9] sm:$0xff]  }
  0x46   :  { %428 = vmatprep.subr.bf16.mxu0 %v624_v1  ;;  %v91_v2 = vld [vmem:[#allocation2] sm:$0xff]  ;;  %v398_v4 = vld [vmem:[#allocation6] ss:$0 sm:$0xff]  ;;  %436 = vmatprep.subr.bf16.mxu1 %v624_v1  ;;  %v92_v8 = vld [vmem:[#allocation2 + $0x8] sm:$0xff]  ;;  %vm625_vm1 = vmmov 0   ;;  %s399_s3 = sld [smem:[#allocation8 + $0x1]] }
  0x47   :  { %429 = vmatpush3.bf16.msra.mxu0 %v469_v0  ;;  %v140_v5 = vmul.f32 %v400_v3, %v91_v2  ;;  %v99_v6 = vmul.f32 %v398_v4, %v91_v2  ;;  %432 = vmatprep.mubr.msk.bf16.mxu0 %vm625_vm1, %v624_v1  ;;  %v141_v11 = vmul.f32 %v400_v3, %v92_v8  ;;  %v471_v16 = vld [vmem:[#allocation10 + $0x38] sm:$0xff]   ;;  %v472_v17 = vld [vmem:[#allocation10 + $0x30] sm:$0xff]   ;;  %v473_v18 = vld [vmem:[#allocation10 + $0x28] sm:$0xff]   ;;  %s94_s4 = sld [smem:[#allocation8]]  ;;  %s626_s25 = smov 96  }
  0x48   :  { %430 = vmatprep.subr.bf16.mxu0 %v624_v1  ;;  %452 = vmatprep.mubr.msk.bf16.mxu1 %vm625_vm1, %v624_v1  ;;  %v100_v12 = vmul.f32 %v398_v4, %v92_v8  ;;  %v174_v14 = vpack.c.bf16 %v92_v8, %v91_v2  ;;  %v474_v19 = vld [vmem:[#allocation10 + $0x20] sm:$0xff]   ;;  %v475_v20 = vld [vmem:[#allocation10 + $0x18] sm:$0xff]   ;;  %v476_v21 = vld [vmem:[#allocation10 + $0x10] sm:$0xff]   ;;  %s627_s26 = smov [#allocation12]  }
  0x49   :  { %v142_v9 = vsel %vm101_vm0, %v140_v5, 0.0  ;;  %v102_v10 = vsel %vm101_vm0, %v99_v6, 0.0  ;;  %v145_v13 = vsel %vm101_vm0, %v141_v11, 0.0  ;;  %437 = vmatpush3.bf16.msra.mxu1 %v471_v16  ;;  %v477_v22 = vld [vmem:[#allocation10 + $0x8] sm:$0xff]   ;;  %v478_v23 = vld [vmem:[#allocation10] sm:$0xff]   ;;  %v237_v11 = vlaneseq  ;;  %s383_s27 = sshll.u32 %s627_s26, 4  ;;  %s384_s27 = int_to_ptr.vmem [resolvable:$true] %s383_s27 }
  0x4a   :  { %143 = vadd.xlane.f32.xlu1 %v142_v9  ;;  %103 = vadd.xlane.f32.xlu0 %v102_v10  ;;  %v105_v15 = vsel %vm101_vm0, %v100_v12, 0.0  ;;  %p588_p12 = scmp.lt.s32.totalorder %s384_s27, %s384_s27 }
  0x4b   :  { %431 = vmatpush3.bf16.msra.mxu0 %v470_v7  ;;  %438 = vmatprep.subr.bf16.mxu1 %v624_v1 }
  0x4c   :  { %v148_v26 = vstv %s399_s3 }
  0x4d   :  { %439 = vmatpush3.bf16.msra.mxu1 %v472_v17  ;;  %v108_v27 = vstv %s94_s4 }
  0x4e   :  { %146 = vadd.xlane.f32.xlu1 %v145_v13  ;;  %106 = vadd.xlane.f32.xlu0 %v105_v15 }
  0x4f   :  { %433 = vmatmul.mubr.msk.bf16.vlgmr.msra.gmra.mxu0 %vm101_vm0, %v174_v14  ;;  %440 = vmatprep.subr.bf16.mxu1 %v624_v1  ;;  %v238_v14 = vand.u32 127, %v237_v11 }
  0x51   :  { %441 = vmatpush3.bf16.msra.mxu1 %v473_v18  ;;  %vm239_vm2 = vcmp.lt.s32.totalorder %v238_v14, 64  ;;  %vm361_vm3 = vcmp.lt.s32.totalorder %v238_v14, 32 }
  0x52   :  { %442 = vmatprep.subr.bf16.mxu1 %v624_v1 }
  0x55   :  { %443 = vmatpush3.bf16.msra.mxu1 %v474_v19 }
  0x56   :  { %444 = vmatprep.subr.bf16.mxu1 %v624_v1 }
  0x59   :  { %445 = vmatpush3.bf16.msra.mxu1 %v475_v20 }
  0x5a   :  { %446 = vmatprep.subr.bf16.mxu1 %v624_v1 }
  0x5d   :  { %447 = vmatpush3.bf16.msra.mxu1 %v476_v21 }
  0x5e   :  { %448 = vmatprep.subr.bf16.mxu1 %v624_v1 }
  0x61   :  { %449 = vmatpush3.bf16.msra.mxu1 %v477_v22 }
  0x62   :  { %450 = vmatprep.subr.bf16.mxu1 %v624_v1 }
  0x65   :  { %451 = vmatpush3.bf16.msra.mxu1 %v478_v23 }
  0xd3   :  { %v144_v24 = vpop.xlane.xlu1 %143  ;;  %v104_v25 = vpop.xlane.xlu0 %103 }
  0xd4   :  { %v149_v30 = vadd.f32 %v148_v26, %v144_v24  ;;  %v109_v31 = vadd.f32 %v108_v27, %v104_v25 }
  0xd7   :  { %v147_v28 = vpop.xlane.xlu1 %146  ;;  %v107_v29 = vpop.xlane.xlu0 %106 }
  0xd8   :  { %v150_v32 = vadd.f32 %v148_v26, %v147_v28  ;;  %v110_v33 = vadd.f32 %v108_v27, %v107_v29  ;;  %v404_v29 = vld [vmem:[%s702_s5] ss:$0 sm:$0xff]  ;;  %s583_s5 = scalar_lea.vmem %s384_s27, 256 }
  0xd9   :  { %p584_p11 = scmp.ne.s32.totalorder %s384_s27, %s583_s5  ;;  %p589_p13 = scmp.lt.s32.totalorder %s583_s5, %s583_s5 }
  0xda   :  { %v151_v34 = vmax.f32 %v149_v30, %v150_v32  ;;  %v111_v35 = vmax.f32 %v109_v31, %v110_v33 }
  0xdb   :  { %p590_p0 = por %p589_p13, %p588_p12 }
  0xdc   :  { %v152_v36 = vrot.slane %v151_v34, 4  ;;  %v112_v37 = vrot.slane %v111_v35, 4 }
  0xdd   :  { %p591_p1 = pnand %p590_p0, %p584_p11 }
  0xde   :  { %v153_v38 = vmax.f32 %v151_v34, %v152_v36  ;;  %v113_v39 = vmax.f32 %v111_v35, %v112_v37 }
  0xe0   :  { %v154_v40 = vrot.slane %v153_v38, 2  ;;  %v114_v41 = vrot.slane %v113_v39, 2 }
  0xe2   :  { %v155_v42 = vmax.f32 %v153_v38, %v154_v40  ;;  %v115_v43 = vmax.f32 %v113_v39, %v114_v41 }
  0xe4   :  { %v156_v44 = vrot.slane %v155_v42, 1  ;;  %v116_v45 = vrot.slane %v115_v43, 1 }
  0xe6   :  { %v157_v46 = vmax.f32 %v155_v42, %v156_v44  ;;  %v117_v47 = vmax.f32 %v115_v43, %v116_v45 }
  0xe8   :  { %v158_v48 = vsub.f32 %v149_v30, %v157_v46  ;;  %v159_v49 = vsub.f32 %v150_v32, %v157_v46  ;;  %v118_v50 = vsub.f32 %v109_v31, %v117_v47  ;;  %v119_v51 = vsub.f32 %v110_v33, %v117_v47 }
  0xea   :  { %v160_v52 = vmul.f32 1.442695, %v158_v48  ;;  %v162_v53 = vmul.f32 1.442695, %v159_v49  ;;  %v120_v54 = vmul.f32 1.442695, %v118_v50 }
  0xeb   :  { %v122_v55 = vmul.f32 1.442695, %v119_v51 }
  0xec   :  { %479 = vpow2.f32 %v160_v52 }
  0xed   :  { %481 = vpow2.f32 %v162_v53 }
  0xee   :  { %483 = vpow2.f32 %v120_v54 }
  0xef   :  { %485 = vpow2.f32 %v122_v55 }
  0xf9   :  { %v480_v56 = vpop.eup %479 }
  0xfa   :  { %v482_v57 = vpop.eup %481 }
  0xfb   :  { %v484_v58 = vpop.eup %483  ;;  %v164_v59 = vadd.f32 %v482_v57, %v480_v56 }
  0xfc   :  { %v486_v60 = vpop.eup %485 }
  0xfd   :  { %v165_v61 = vrot.slane %v164_v59, 4  ;;  %v124_v62 = vadd.f32 %v486_v60, %v484_v58 }
  0xff   :  { %v166_v63 = vadd.f32 %v165_v61, %v164_v59  ;;  %v125_v0 = vrot.slane %v124_v62, 4 }
 0x101   :  { %v167_v1 = vrot.slane %v166_v63, 2  ;;  %v126_v2 = vadd.f32 %v125_v0, %v124_v62 }
 0x103   :  { %v168_v3 = vadd.f32 %v167_v1, %v166_v63  ;;  %v127_v4 = vrot.slane %v126_v2, 2 }
 0x105   :  { %v169_v5 = vrot.slane %v168_v3, 1  ;;  %v128_v6 = vadd.f32 %v127_v4, %v126_v2 }
 0x107   :  { %v170_v7 = vadd.f32 %v169_v5, %v168_v3  ;;  %v129_v8 = vrot.slane %v128_v6, 1 }
 0x109   :  { %v130_v9 = vadd.f32 %v129_v8, %v128_v6  ;;  %487 = vrcp.f32 %v170_v7 }
 0x10b   :  { %489 = vrcp.f32 %v130_v9 }
 0x10f   :  { %v228_v10 = vpop.f32.mrf.mxu0 }
 0x110   :  { %v235_v20 = vmax.f32 %v228_v10, 0.0 }
 0x111   :  { %v434_v12 = vpop.f32.mrf.mxu0 }
 0x113   :  { %v231_v13 = vpop.f32.mrf.mxu0 }
 0x114   :  { %v236_v21 = vmax.f32 %v231_v13, 0.0 }
 0x115   :  { %v435_v15 = vpop.f32.mrf.mxu0 }
 0x116   :  { %v488_v16 = vpop.eup %487  ;;  %v414_v28 = vpack.c.bf16 %v236_v21, %v235_v20 }
 0x117   :  { %v172_v17 = vmul.f32 %v488_v16, %v480_v56  ;;  %v173_v18 = vmul.f32 %v488_v16, %v482_v57 }
 0x118   :  { %v490_v19 = vpop.eup %489 }
 0x119   :  { %v132_v22 = vmul.f32 %v490_v19, %v484_v58  ;;  %v133_v23 = vmul.f32 %v490_v19, %v486_v60 }
 0x11b   :  { %v240_v24 = vsel %vm239_vm2, %v132_v22, %v172_v17  ;;  %v241_v25 = vsel %vm239_vm2, %v133_v23, %v173_v18  ;;  %v362_v26 = vsel %vm361_vm3, %v132_v22, %v172_v17  ;;  %v363_v27 = vsel %vm361_vm3, %v133_v23, %v173_v18 }
 0x11c   :  { %vm242_vm4 = vcmp.gt.f32.partialorder %v240_v24, 0.5  ;;  %vm243_vm5 = vcmp.gt.f32.partialorder %v241_v25, 0.5 }
 0x11d   :  { %vm413_vm6 = vmpackc.low %vm243_vm5, %vm242_vm4 }
 0x11e   :  { %453 = vmatmul.mubr.msk.bf16.vlgmr.msra.gmra.mxu1 %vm413_vm6, %v414_v28 }
 0x1de   :  { %v352_v30 = vpop.f32.mrf.mxu1 }
 0x1df   :  { %v353_v31 = vadd.f32 %v404_v29, %v352_v30 }
 0x1e0   :  { %v454_v32 = vpop.f32.mrf.mxu1 }
 0x1e1   :  { %v359_v33 = vmax.f32 %v353_v31, 0.0 }
 0x1e2   :  { %v355_v34 = vpop.f32.mrf.mxu1 }
 0x1e3   :  { %v364_v35 = vmul.f32 %v362_v26, %v359_v33  ;;  %v356_v36 = vadd.f32 %v404_v29, %v355_v34 }
 0x1e4   :  { %v455_v37 = vpop.f32.mrf.mxu1 }
 0x1e5   :  { %v360_v38 = vmax.f32 %v356_v36, 0.0  ;;  %368 = vrot.lane.b32.xlu0 %v364_v35, %s626_s25 }
 0x1e7   :  { %v365_v39 = vmul.f32 %v363_v27, %v360_v38 }
 0x1e9   :  { %370 = vrot.lane.b32.xlu1 %v365_v39, %s626_s25 }
 0x257   :  { %v369_v40 = vpop.permute.xlu0 %368 }
 0x258   :  { %v374_v41 = vadd.f32 %v369_v40, %v364_v35 }
 0x25a   :  { %376 = vst.msk [vmem:[#allocation12] sm:$0xff] %vm101_vm0, %v374_v41 }
 0x25b   :  { %v371_v42 = vpop.permute.xlu1 %370 }
 0x25c   :  { %v375_v43 = vadd.f32 %v371_v42, %v365_v39 }
 0x25e   :  { %377 = vst.msk [vmem:[#allocation12 + $0x8] sm:$0xff] %vm101_vm0, %v375_v43 }
 0x25f   :  { %594 = shalt.err (!%p591_p1)
}
 0x260   :  { %389 = dma.vmem_to_hbm [thread:$0]  %s384_s27, 256, %s703_s6, [#allocation4], %s617_s29, %s617_s29, %s618_s30  }
 0x261   :  { %613 = dma.done.wait [#allocation4], 256  }
 0x262   :  { %614 = vsyncadd [#allocation4], 4294967040 }
 0x263   :  { %393 = vsyncpa [#allocation3], 1 }
 0x264   :  { %394 = vsyncpa [#allocation7], 1 }
 0x265   :  { %395 = vsyncpa [#allocation11], 1 }
 0x266   :  { %396 = vsyncpa [#allocation4], 1 }
 0x267   :  { %397 = vsyncpa [#allocation5], 1 }

</bundles_post_ra>
